<compile_context>
chip_gen: v6e
topology: v6e:2x2x1
jax: 0.10.0
libtpu: 0.0.40
codegen_flags: <defaults>
</compile_context>

<pallas_src>
import functools
import math

import jax
import jax.numpy as jnp
from jax.experimental import pallas as pl
from jax.experimental.pallas import tpu as pltpu


def _round_up(x: int, m: int) -> int:
    return ((x + m - 1) // m) * m


def _embedding_gather_kernel(idx_ref, table_ref, out_ref, rows_ref, sems,
                             *, scale, block_n, inflight):
    # idx_ref:   (n_pad,) int32 in SMEM (scalar prefetch)
    # table_ref: (vocab, D) raw HBM ref (memory_space=pl.ANY)
    # out_ref:   (block_n, D) output block in VMEM
    # rows_ref:  (block_n, D) VMEM scratch for gathered rows
    # sems:      (inflight,) DMA semaphores (rolling window)
    base = pl.program_id(0) * block_n

    def start(t):
        tok = idx_ref[base + t]                       # scalar read from SMEM
        pltpu.make_async_copy(
            table_ref.at[pl.ds(tok, 1), :],           # one table row in HBM
            rows_ref.at[pl.ds(t, 1), :],
            sems.at[t % inflight],
        ).start()

    def wait(t):
        pltpu.make_async_copy(
            table_ref.at[pl.ds(0, 1), :],             # dummy src, same shape/bytes
            rows_ref.at[pl.ds(t, 1), :],
            sems.at[t % inflight],
        ).wait()

    # Prime the pipeline with `inflight` row fetches.
    for t in range(inflight):
        start(t)

    # Rolling wait / prefetch over the remaining tokens of this block.
    @pl.loop(0, block_n)
    def _(t):
        wait(t)

        @pl.when(t + inflight < block_n)
        def _():
            start(t + inflight)

    # Fused sqrt(num_features) scale on the lane-dense output block.
    out_ref[...] = (rows_ref[...] * scale).astype(out_ref.dtype)


def embeddings_forward(input_idx, table, *, block_n=128, inflight=16):
    """input_idx: int (batch, seq); table: (vocab, num_features) embedding table.

    Returns table[input_idx] * sqrt(num_features), matching
    Embeddings(vocab, num_features).forward(input_idx).
    """
    batch, seq = input_idx.shape
    vocab, num_features = table.shape
    n = batch * seq
    scale = float(math.sqrt(num_features))

    # Shrink the token block for tiny inputs; keep it a multiple of 8 (sublanes).
    block_n = max(8, min(block_n, _round_up(n, 8)))
    inflight = max(1, min(inflight, block_n))
    n_pad = _round_up(n, block_n)

    # Indices: flatten, clamp (PyTorch would raise on OOB; clamping keeps the
    # gather DMA in bounds), and zero-pad the tail so every block is full.
    idx_flat = jnp.clip(input_idx.reshape(n).astype(jnp.int32), 0, vocab - 1)
    if n_pad != n:
        idx_flat = jnp.concatenate(
            [idx_flat, jnp.zeros((n_pad - n,), jnp.int32)])

    kernel = functools.partial(
        _embedding_gather_kernel,
        scale=scale, block_n=block_n, inflight=inflight)

    out_flat = pl.pallas_call(
        kernel,
        out_shape=jax.ShapeDtypeStruct((n_pad, num_features), table.dtype),
        grid_spec=pltpu.PrefetchScalarGridSpec(
            num_scalar_prefetch=1,                    # idx_flat -> SMEM
            grid=(n_pad // block_n,),
            in_specs=[
                pl.BlockSpec(memory_space=pl.ANY),    # table stays in HBM
            ],
            out_specs=pl.BlockSpec((block_n, num_features),
                                   lambda i, idx_ref: (i, 0)),
            scratch_shapes=[
                pltpu.VMEM((block_n, num_features), table.dtype),
                pltpu.SemaphoreType.DMA((inflight,)),
            ],
        ),
        compiler_params=pltpu.CompilerParams(
            dimension_semantics=("parallel",)),
    )(idx_flat, table)

    return out_flat[:n].reshape(batch, seq, num_features)


if __name__ == "__main__":
    # Small deterministic example consistent with Embeddings(vocab_size, num_features).
    # num_features is a multiple of 128 to keep the output lane-dense.
    vocab_size = 256
    num_features = 128
    batch, seq = 2, 8

    key = jax.random.PRNGKey(0)
    k_table, k_idx = jax.random.split(key)
    # nn.Embedding default init ~ N(0, 1)
    table = jax.random.normal(k_table, (vocab_size, num_features),
                              dtype=jnp.float32)
    input_idx = jax.random.randint(k_idx, (batch, seq), 0, vocab_size,
                                   dtype=jnp.int32)

    out = embeddings_forward(input_idx, table)
    out = jax.block_until_ready(out)

    # Reference check (plain JAX gather) to make sure semantics match.
    ref = table[input_idx] * math.sqrt(num_features)
    assert out.shape == (batch, seq, num_features)
    assert jnp.allclose(out, ref, atol=1e-5, rtol=1e-5)

    print("KERNEL_OK")
</pallas_src>

<mosaic_0001>
module attributes {stable_mosaic.version = 11 : i64} {
  func.func @_embedding_gather_kernel(%arg0: i32, %arg1: memref<16xi32, #tpu.memory_space<smem>>, %arg2: memref<256x128xf32, #tpu.memory_space<any>>, %arg3: memref<16x128xf32, #tpu.memory_space<vmem>>, %arg4: memref<16x128xf32, #tpu.memory_space<vmem>>, %arg5: memref<16x!tpu.dma_semaphore, #tpu.memory_space<semaphore_mem>>) attributes {dimension_semantics = [#tpu.dimension_semantics<parallel>], iteration_bounds = array<i64: 1>, scalar_prefetch = 1 : i64, scratch_operands = 2 : i64, tpu.core_type = #tpu.core_type<tc>, window_params = [{}, {transform_indices = @transform_1, window_bounds = array<i64: 16, 128>}]} {
    %c16_i32 = arith.constant 16 : i32
    %0 = arith.muli %arg0, %c16_i32 : i32
    %c0_i32 = arith.constant 0 : i32
    %1 = arith.addi %0, %c0_i32 : i32
    %2 = arith.index_cast %1 : i32 to index
    %3 = memref.load %arg1[%2] : memref<16xi32, #tpu.memory_space<smem>>
    %c0_i32_0 = arith.constant 0 : i32
    %c0_i32_1 = arith.constant 0 : i32
    %4 = tpu.memref_slice %arg2[%3, %c0_i32_1] : memref<256x128xf32, #tpu.memory_space<any>> -> memref<1x128xf32, #tpu.memory_space<any>>
    %c0_i32_2 = arith.constant 0 : i32
    %c0_i32_3 = arith.constant 0 : i32
    %5 = tpu.memref_slice %arg4[%c0_i32_2, %c0_i32_3] : memref<16x128xf32, #tpu.memory_space<vmem>> -> memref<1x128xf32, #tpu.memory_space<vmem>>
    %6 = tpu.memref_slice %arg5[%c0_i32_0] : memref<16x!tpu.dma_semaphore, #tpu.memory_space<semaphore_mem>> -> memref<1x!tpu.dma_semaphore, #tpu.memory_space<semaphore_mem>>
    %7 = tpu.memref_squeeze %6 : memref<1x!tpu.dma_semaphore, #tpu.memory_space<semaphore_mem>> -> memref<!tpu.dma_semaphore, #tpu.memory_space<semaphore_mem>>
    tpu.enqueue_dma source(%4 : memref<1x128xf32, #tpu.memory_space<any>>) target(%5 : memref<1x128xf32, #tpu.memory_space<vmem>>) target_semaphore(%7 : memref<!tpu.dma_semaphore, #tpu.memory_space<semaphore_mem>>)
    %c1_i32 = arith.constant 1 : i32
    %8 = arith.addi %0, %c1_i32 : i32
    %9 = arith.index_cast %8 : i32 to index
    %10 = memref.load %arg1[%9] : memref<16xi32, #tpu.memory_space<smem>>
    %c1_i32_4 = arith.constant 1 : i32
    %c0_i32_5 = arith.constant 0 : i32
    %11 = tpu.memref_slice %arg2[%10, %c0_i32_5] : memref<256x128xf32, #tpu.memory_space<any>> -> memref<1x128xf32, #tpu.memory_space<any>>
    %c1_i32_6 = arith.constant 1 : i32
    %c0_i32_7 = arith.constant 0 : i32
    %12 = tpu.memref_slice %arg4[%c1_i32_6, %c0_i32_7] : memref<16x128xf32, #tpu.memory_space<vmem>> -> memref<1x128xf32, #tpu.memory_space<vmem>>
    %13 = tpu.memref_slice %arg5[%c1_i32_4] : memref<16x!tpu.dma_semaphore, #tpu.memory_space<semaphore_mem>> -> memref<1x!tpu.dma_semaphore, #tpu.memory_space<semaphore_mem>>
    %14 = tpu.memref_squeeze %13 : memref<1x!tpu.dma_semaphore, #tpu.memory_space<semaphore_mem>> -> memref<!tpu.dma_semaphore, #tpu.memory_space<semaphore_mem>>
    tpu.enqueue_dma source(%11 : memref<1x128xf32, #tpu.memory_space<any>>) target(%12 : memref<1x128xf32, #tpu.memory_space<vmem>>) target_semaphore(%14 : memref<!tpu.dma_semaphore, #tpu.memory_space<semaphore_mem>>)
    %c2_i32 = arith.constant 2 : i32
    %15 = arith.addi %0, %c2_i32 : i32
    %16 = arith.index_cast %15 : i32 to index
    %17 = memref.load %arg1[%16] : memref<16xi32, #tpu.memory_space<smem>>
    %c2_i32_8 = arith.constant 2 : i32
    %c0_i32_9 = arith.constant 0 : i32
    %18 = tpu.memref_slice %arg2[%17, %c0_i32_9] : memref<256x128xf32, #tpu.memory_space<any>> -> memref<1x128xf32, #tpu.memory_space<any>>
    %c2_i32_10 = arith.constant 2 : i32
    %c0_i32_11 = arith.constant 0 : i32
    %19 = tpu.memref_slice %arg4[%c2_i32_10, %c0_i32_11] : memref<16x128xf32, #tpu.memory_space<vmem>> -> memref<1x128xf32, #tpu.memory_space<vmem>>
    %20 = tpu.memref_slice %arg5[%c2_i32_8] : memref<16x!tpu.dma_semaphore, #tpu.memory_space<semaphore_mem>> -> memref<1x!tpu.dma_semaphore, #tpu.memory_space<semaphore_mem>>
    %21 = tpu.memref_squeeze %20 : memref<1x!tpu.dma_semaphore, #tpu.memory_space<semaphore_mem>> -> memref<!tpu.dma_semaphore, #tpu.memory_space<semaphore_mem>>
    tpu.enqueue_dma source(%18 : memref<1x128xf32, #tpu.memory_space<any>>) target(%19 : memref<1x128xf32, #tpu.memory_space<vmem>>) target_semaphore(%21 : memref<!tpu.dma_semaphore, #tpu.memory_space<semaphore_mem>>)
    %c3_i32 = arith.constant 3 : i32
    %22 = arith.addi %0, %c3_i32 : i32
    %23 = arith.index_cast %22 : i32 to index
    %24 = memref.load %arg1[%23] : memref<16xi32, #tpu.memory_space<smem>>
    %c3_i32_12 = arith.constant 3 : i32
    %c0_i32_13 = arith.constant 0 : i32
    %25 = tpu.memref_slice %arg2[%24, %c0_i32_13] : memref<256x128xf32, #tpu.memory_space<any>> -> memref<1x128xf32, #tpu.memory_space<any>>
    %c3_i32_14 = arith.constant 3 : i32
    %c0_i32_15 = arith.constant 0 : i32
    %26 = tpu.memref_slice %arg4[%c3_i32_14, %c0_i32_15] : memref<16x128xf32, #tpu.memory_space<vmem>> -> memref<1x128xf32, #tpu.memory_space<vmem>>
    %27 = tpu.memref_slice %arg5[%c3_i32_12] : memref<16x!tpu.dma_semaphore, #tpu.memory_space<semaphore_mem>> -> memref<1x!tpu.dma_semaphore, #tpu.memory_space<semaphore_mem>>
    %28 = tpu.memref_squeeze %27 : memref<1x!tpu.dma_semaphore, #tpu.memory_space<semaphore_mem>> -> memref<!tpu.dma_semaphore, #tpu.memory_space<semaphore_mem>>
    tpu.enqueue_dma source(%25 : memref<1x128xf32, #tpu.memory_space<any>>) target(%26 : memref<1x128xf32, #tpu.memory_space<vmem>>) target_semaphore(%28 : memref<!tpu.dma_semaphore, #tpu.memory_space<semaphore_mem>>)
    %c4_i32 = arith.constant 4 : i32
    %29 = arith.addi %0, %c4_i32 : i32
    %30 = arith.index_cast %29 : i32 to index
    %31 = memref.load %arg1[%30] : memref<16xi32, #tpu.memory_space<smem>>
    %c4_i32_16 = arith.constant 4 : i32
    %c0_i32_17 = arith.constant 0 : i32
    %32 = tpu.memref_slice %arg2[%31, %c0_i32_17] : memref<256x128xf32, #tpu.memory_space<any>> -> memref<1x128xf32, #tpu.memory_space<any>>
    %c4_i32_18 = arith.constant 4 : i32
    %c0_i32_19 = arith.constant 0 : i32
    %33 = tpu.memref_slice %arg4[%c4_i32_18, %c0_i32_19] : memref<16x128xf32, #tpu.memory_space<vmem>> -> memref<1x128xf32, #tpu.memory_space<vmem>>
    %34 = tpu.memref_slice %arg5[%c4_i32_16] : memref<16x!tpu.dma_semaphore, #tpu.memory_space<semaphore_mem>> -> memref<1x!tpu.dma_semaphore, #tpu.memory_space<semaphore_mem>>
    %35 = tpu.memref_squeeze %34 : memref<1x!tpu.dma_semaphore, #tpu.memory_space<semaphore_mem>> -> memref<!tpu.dma_semaphore, #tpu.memory_space<semaphore_mem>>
    tpu.enqueue_dma source(%32 : memref<1x128xf32, #tpu.memory_space<any>>) target(%33 : memref<1x128xf32, #tpu.memory_space<vmem>>) target_semaphore(%35 : memref<!tpu.dma_semaphore, #tpu.memory_space<semaphore_mem>>)
    %c5_i32 = arith.constant 5 : i32
    %36 = arith.addi %0, %c5_i32 : i32
    %37 = arith.index_cast %36 : i32 to index
    %38 = memref.load %arg1[%37] : memref<16xi32, #tpu.memory_space<smem>>
    %c5_i32_20 = arith.constant 5 : i32
    %c0_i32_21 = arith.constant 0 : i32
    %39 = tpu.memref_slice %arg2[%38, %c0_i32_21] : memref<256x128xf32, #tpu.memory_space<any>> -> memref<1x128xf32, #tpu.memory_space<any>>
    %c5_i32_22 = arith.constant 5 : i32
    %c0_i32_23 = arith.constant 0 : i32
    %40 = tpu.memref_slice %arg4[%c5_i32_22, %c0_i32_23] : memref<16x128xf32, #tpu.memory_space<vmem>> -> memref<1x128xf32, #tpu.memory_space<vmem>>
    %41 = tpu.memref_slice %arg5[%c5_i32_20] : memref<16x!tpu.dma_semaphore, #tpu.memory_space<semaphore_mem>> -> memref<1x!tpu.dma_semaphore, #tpu.memory_space<semaphore_mem>>
    %42 = tpu.memref_squeeze %41 : memref<1x!tpu.dma_semaphore, #tpu.memory_space<semaphore_mem>> -> memref<!tpu.dma_semaphore, #tpu.memory_space<semaphore_mem>>
    tpu.enqueue_dma source(%39 : memref<1x128xf32, #tpu.memory_space<any>>) target(%40 : memref<1x128xf32, #tpu.memory_space<vmem>>) target_semaphore(%42 : memref<!tpu.dma_semaphore, #tpu.memory_space<semaphore_mem>>)
    %c6_i32 = arith.constant 6 : i32
    %43 = arith.addi %0, %c6_i32 : i32
    %44 = arith.index_cast %43 : i32 to index
    %45 = memref.load %arg1[%44] : memref<16xi32, #tpu.memory_space<smem>>
    %c6_i32_24 = arith.constant 6 : i32
    %c0_i32_25 = arith.constant 0 : i32
    %46 = tpu.memref_slice %arg2[%45, %c0_i32_25] : memref<256x128xf32, #tpu.memory_space<any>> -> memref<1x128xf32, #tpu.memory_space<any>>
    %c6_i32_26 = arith.constant 6 : i32
    %c0_i32_27 = arith.constant 0 : i32
    %47 = tpu.memref_slice %arg4[%c6_i32_26, %c0_i32_27] : memref<16x128xf32, #tpu.memory_space<vmem>> -> memref<1x128xf32, #tpu.memory_space<vmem>>
    %48 = tpu.memref_slice %arg5[%c6_i32_24] : memref<16x!tpu.dma_semaphore, #tpu.memory_space<semaphore_mem>> -> memref<1x!tpu.dma_semaphore, #tpu.memory_space<semaphore_mem>>
    %49 = tpu.memref_squeeze %48 : memref<1x!tpu.dma_semaphore, #tpu.memory_space<semaphore_mem>> -> memref<!tpu.dma_semaphore, #tpu.memory_space<semaphore_mem>>
    tpu.enqueue_dma source(%46 : memref<1x128xf32, #tpu.memory_space<any>>) target(%47 : memref<1x128xf32, #tpu.memory_space<vmem>>) target_semaphore(%49 : memref<!tpu.dma_semaphore, #tpu.memory_space<semaphore_mem>>)
    %c7_i32 = arith.constant 7 : i32
    %50 = arith.addi %0, %c7_i32 : i32
    %51 = arith.index_cast %50 : i32 to index
    %52 = memref.load %arg1[%51] : memref<16xi32, #tpu.memory_space<smem>>
    %c7_i32_28 = arith.constant 7 : i32
    %c0_i32_29 = arith.constant 0 : i32
    %53 = tpu.memref_slice %arg2[%52, %c0_i32_29] : memref<256x128xf32, #tpu.memory_space<any>> -> memref<1x128xf32, #tpu.memory_space<any>>
    %c7_i32_30 = arith.constant 7 : i32
    %c0_i32_31 = arith.constant 0 : i32
    %54 = tpu.memref_slice %arg4[%c7_i32_30, %c0_i32_31] : memref<16x128xf32, #tpu.memory_space<vmem>> -> memref<1x128xf32, #tpu.memory_space<vmem>>
    %55 = tpu.memref_slice %arg5[%c7_i32_28] : memref<16x!tpu.dma_semaphore, #tpu.memory_space<semaphore_mem>> -> memref<1x!tpu.dma_semaphore, #tpu.memory_space<semaphore_mem>>
    %56 = tpu.memref_squeeze %55 : memref<1x!tpu.dma_semaphore, #tpu.memory_space<semaphore_mem>> -> memref<!tpu.dma_semaphore, #tpu.memory_space<semaphore_mem>>
    tpu.enqueue_dma source(%53 : memref<1x128xf32, #tpu.memory_space<any>>) target(%54 : memref<1x128xf32, #tpu.memory_space<vmem>>) target_semaphore(%56 : memref<!tpu.dma_semaphore, #tpu.memory_space<semaphore_mem>>)
    %c8_i32 = arith.constant 8 : i32
    %57 = arith.addi %0, %c8_i32 : i32
    %58 = arith.index_cast %57 : i32 to index
    %59 = memref.load %arg1[%58] : memref<16xi32, #tpu.memory_space<smem>>
    %c8_i32_32 = arith.constant 8 : i32
    %c0_i32_33 = arith.constant 0 : i32
    %60 = tpu.memref_slice %arg2[%59, %c0_i32_33] : memref<256x128xf32, #tpu.memory_space<any>> -> memref<1x128xf32, #tpu.memory_space<any>>
    %c8_i32_34 = arith.constant 8 : i32
    %c0_i32_35 = arith.constant 0 : i32
    %61 = tpu.memref_slice %arg4[%c8_i32_34, %c0_i32_35] : memref<16x128xf32, #tpu.memory_space<vmem>> -> memref<1x128xf32, #tpu.memory_space<vmem>>
    %62 = tpu.memref_slice %arg5[%c8_i32_32] : memref<16x!tpu.dma_semaphore, #tpu.memory_space<semaphore_mem>> -> memref<1x!tpu.dma_semaphore, #tpu.memory_space<semaphore_mem>>
    %63 = tpu.memref_squeeze %62 : memref<1x!tpu.dma_semaphore, #tpu.memory_space<semaphore_mem>> -> memref<!tpu.dma_semaphore, #tpu.memory_space<semaphore_mem>>
    tpu.enqueue_dma source(%60 : memref<1x128xf32, #tpu.memory_space<any>>) target(%61 : memref<1x128xf32, #tpu.memory_space<vmem>>) target_semaphore(%63 : memref<!tpu.dma_semaphore, #tpu.memory_space<semaphore_mem>>)
    %c9_i32 = arith.constant 9 : i32
    %64 = arith.addi %0, %c9_i32 : i32
    %65 = arith.index_cast %64 : i32 to index
    %66 = memref.load %arg1[%65] : memref<16xi32, #tpu.memory_space<smem>>
    %c9_i32_36 = arith.constant 9 : i32
    %c0_i32_37 = arith.constant 0 : i32
    %67 = tpu.memref_slice %arg2[%66, %c0_i32_37] : memref<256x128xf32, #tpu.memory_space<any>> -> memref<1x128xf32, #tpu.memory_space<any>>
    %c9_i32_38 = arith.constant 9 : i32
    %c0_i32_39 = arith.constant 0 : i32
    %68 = tpu.memref_slice %arg4[%c9_i32_38, %c0_i32_39] : memref<16x128xf32, #tpu.memory_space<vmem>> -> memref<1x128xf32, #tpu.memory_space<vmem>>
    %69 = tpu.memref_slice %arg5[%c9_i32_36] : memref<16x!tpu.dma_semaphore, #tpu.memory_space<semaphore_mem>> -> memref<1x!tpu.dma_semaphore, #tpu.memory_space<semaphore_mem>>
    %70 = tpu.memref_squeeze %69 : memref<1x!tpu.dma_semaphore, #tpu.memory_space<semaphore_mem>> -> memref<!tpu.dma_semaphore, #tpu.memory_space<semaphore_mem>>
    tpu.enqueue_dma source(%67 : memref<1x128xf32, #tpu.memory_space<any>>) target(%68 : memref<1x128xf32, #tpu.memory_space<vmem>>) target_semaphore(%70 : memref<!tpu.dma_semaphore, #tpu.memory_space<semaphore_mem>>)
    %c10_i32 = arith.constant 10 : i32
    %71 = arith.addi %0, %c10_i32 : i32
    %72 = arith.index_cast %71 : i32 to index
    %73 = memref.load %arg1[%72] : memref<16xi32, #tpu.memory_space<smem>>
    %c10_i32_40 = arith.constant 10 : i32
    %c0_i32_41 = arith.constant 0 : i32
    %74 = tpu.memref_slice %arg2[%73, %c0_i32_41] : memref<256x128xf32, #tpu.memory_space<any>> -> memref<1x128xf32, #tpu.memory_space<any>>
    %c10_i32_42 = arith.constant 10 : i32
    %c0_i32_43 = arith.constant 0 : i32
    %75 = tpu.memref_slice %arg4[%c10_i32_42, %c0_i32_43] : memref<16x128xf32, #tpu.memory_space<vmem>> -> memref<1x128xf32, #tpu.memory_space<vmem>>
    %76 = tpu.memref_slice %arg5[%c10_i32_40] : memref<16x!tpu.dma_semaphore, #tpu.memory_space<semaphore_mem>> -> memref<1x!tpu.dma_semaphore, #tpu.memory_space<semaphore_mem>>
    %77 = tpu.memref_squeeze %76 : memref<1x!tpu.dma_semaphore, #tpu.memory_space<semaphore_mem>> -> memref<!tpu.dma_semaphore, #tpu.memory_space<semaphore_mem>>
    tpu.enqueue_dma source(%74 : memref<1x128xf32, #tpu.memory_space<any>>) target(%75 : memref<1x128xf32, #tpu.memory_space<vmem>>) target_semaphore(%77 : memref<!tpu.dma_semaphore, #tpu.memory_space<semaphore_mem>>)
    %c11_i32 = arith.constant 11 : i32
    %78 = arith.addi %0, %c11_i32 : i32
    %79 = arith.index_cast %78 : i32 to index
    %80 = memref.load %arg1[%79] : memref<16xi32, #tpu.memory_space<smem>>
    %c11_i32_44 = arith.constant 11 : i32
    %c0_i32_45 = arith.constant 0 : i32
    %81 = tpu.memref_slice %arg2[%80, %c0_i32_45] : memref<256x128xf32, #tpu.memory_space<any>> -> memref<1x128xf32, #tpu.memory_space<any>>
    %c11_i32_46 = arith.constant 11 : i32
    %c0_i32_47 = arith.constant 0 : i32
    %82 = tpu.memref_slice %arg4[%c11_i32_46, %c0_i32_47] : memref<16x128xf32, #tpu.memory_space<vmem>> -> memref<1x128xf32, #tpu.memory_space<vmem>>
    %83 = tpu.memref_slice %arg5[%c11_i32_44] : memref<16x!tpu.dma_semaphore, #tpu.memory_space<semaphore_mem>> -> memref<1x!tpu.dma_semaphore, #tpu.memory_space<semaphore_mem>>
    %84 = tpu.memref_squeeze %83 : memref<1x!tpu.dma_semaphore, #tpu.memory_space<semaphore_mem>> -> memref<!tpu.dma_semaphore, #tpu.memory_space<semaphore_mem>>
    tpu.enqueue_dma source(%81 : memref<1x128xf32, #tpu.memory_space<any>>) target(%82 : memref<1x128xf32, #tpu.memory_space<vmem>>) target_semaphore(%84 : memref<!tpu.dma_semaphore, #tpu.memory_space<semaphore_mem>>)
    %c12_i32 = arith.constant 12 : i32
    %85 = arith.addi %0, %c12_i32 : i32
    %86 = arith.index_cast %85 : i32 to index
    %87 = memref.load %arg1[%86] : memref<16xi32, #tpu.memory_space<smem>>
    %c12_i32_48 = arith.constant 12 : i32
    %c0_i32_49 = arith.constant 0 : i32
    %88 = tpu.memref_slice %arg2[%87, %c0_i32_49] : memref<256x128xf32, #tpu.memory_space<any>> -> memref<1x128xf32, #tpu.memory_space<any>>
    %c12_i32_50 = arith.constant 12 : i32
    %c0_i32_51 = arith.constant 0 : i32
    %89 = tpu.memref_slice %arg4[%c12_i32_50, %c0_i32_51] : memref<16x128xf32, #tpu.memory_space<vmem>> -> memref<1x128xf32, #tpu.memory_space<vmem>>
    %90 = tpu.memref_slice %arg5[%c12_i32_48] : memref<16x!tpu.dma_semaphore, #tpu.memory_space<semaphore_mem>> -> memref<1x!tpu.dma_semaphore, #tpu.memory_space<semaphore_mem>>
    %91 = tpu.memref_squeeze %90 : memref<1x!tpu.dma_semaphore, #tpu.memory_space<semaphore_mem>> -> memref<!tpu.dma_semaphore, #tpu.memory_space<semaphore_mem>>
    tpu.enqueue_dma source(%88 : memref<1x128xf32, #tpu.memory_space<any>>) target(%89 : memref<1x128xf32, #tpu.memory_space<vmem>>) target_semaphore(%91 : memref<!tpu.dma_semaphore, #tpu.memory_space<semaphore_mem>>)
    %c13_i32 = arith.constant 13 : i32
    %92 = arith.addi %0, %c13_i32 : i32
    %93 = arith.index_cast %92 : i32 to index
    %94 = memref.load %arg1[%93] : memref<16xi32, #tpu.memory_space<smem>>
    %c13_i32_52 = arith.constant 13 : i32
    %c0_i32_53 = arith.constant 0 : i32
    %95 = tpu.memref_slice %arg2[%94, %c0_i32_53] : memref<256x128xf32, #tpu.memory_space<any>> -> memref<1x128xf32, #tpu.memory_space<any>>
    %c13_i32_54 = arith.constant 13 : i32
    %c0_i32_55 = arith.constant 0 : i32
    %96 = tpu.memref_slice %arg4[%c13_i32_54, %c0_i32_55] : memref<16x128xf32, #tpu.memory_space<vmem>> -> memref<1x128xf32, #tpu.memory_space<vmem>>
    %97 = tpu.memref_slice %arg5[%c13_i32_52] : memref<16x!tpu.dma_semaphore, #tpu.memory_space<semaphore_mem>> -> memref<1x!tpu.dma_semaphore, #tpu.memory_space<semaphore_mem>>
    %98 = tpu.memref_squeeze %97 : memref<1x!tpu.dma_semaphore, #tpu.memory_space<semaphore_mem>> -> memref<!tpu.dma_semaphore, #tpu.memory_space<semaphore_mem>>
    tpu.enqueue_dma source(%95 : memref<1x128xf32, #tpu.memory_space<any>>) target(%96 : memref<1x128xf32, #tpu.memory_space<vmem>>) target_semaphore(%98 : memref<!tpu.dma_semaphore, #tpu.memory_space<semaphore_mem>>)
    %c14_i32 = arith.constant 14 : i32
    %99 = arith.addi %0, %c14_i32 : i32
    %100 = arith.index_cast %99 : i32 to index
    %101 = memref.load %arg1[%100] : memref<16xi32, #tpu.memory_space<smem>>
    %c14_i32_56 = arith.constant 14 : i32
    %c0_i32_57 = arith.constant 0 : i32
    %102 = tpu.memref_slice %arg2[%101, %c0_i32_57] : memref<256x128xf32, #tpu.memory_space<any>> -> memref<1x128xf32, #tpu.memory_space<any>>
    %c14_i32_58 = arith.constant 14 : i32
    %c0_i32_59 = arith.constant 0 : i32
    %103 = tpu.memref_slice %arg4[%c14_i32_58, %c0_i32_59] : memref<16x128xf32, #tpu.memory_space<vmem>> -> memref<1x128xf32, #tpu.memory_space<vmem>>
    %104 = tpu.memref_slice %arg5[%c14_i32_56] : memref<16x!tpu.dma_semaphore, #tpu.memory_space<semaphore_mem>> -> memref<1x!tpu.dma_semaphore, #tpu.memory_space<semaphore_mem>>
    %105 = tpu.memref_squeeze %104 : memref<1x!tpu.dma_semaphore, #tpu.memory_space<semaphore_mem>> -> memref<!tpu.dma_semaphore, #tpu.memory_space<semaphore_mem>>
    tpu.enqueue_dma source(%102 : memref<1x128xf32, #tpu.memory_space<any>>) target(%103 : memref<1x128xf32, #tpu.memory_space<vmem>>) target_semaphore(%105 : memref<!tpu.dma_semaphore, #tpu.memory_space<semaphore_mem>>)
    %c15_i32 = arith.constant 15 : i32
    %106 = arith.addi %0, %c15_i32 : i32
    %107 = arith.index_cast %106 : i32 to index
    %108 = memref.load %arg1[%107] : memref<16xi32, #tpu.memory_space<smem>>
    %c15_i32_60 = arith.constant 15 : i32
    %c0_i32_61 = arith.constant 0 : i32
    %109 = tpu.memref_slice %arg2[%108, %c0_i32_61] : memref<256x128xf32, #tpu.memory_space<any>> -> memref<1x128xf32, #tpu.memory_space<any>>
    %c15_i32_62 = arith.constant 15 : i32
    %c0_i32_63 = arith.constant 0 : i32
    %110 = tpu.memref_slice %arg4[%c15_i32_62, %c0_i32_63] : memref<16x128xf32, #tpu.memory_space<vmem>> -> memref<1x128xf32, #tpu.memory_space<vmem>>
    %111 = tpu.memref_slice %arg5[%c15_i32_60] : memref<16x!tpu.dma_semaphore, #tpu.memory_space<semaphore_mem>> -> memref<1x!tpu.dma_semaphore, #tpu.memory_space<semaphore_mem>>
    %112 = tpu.memref_squeeze %111 : memref<1x!tpu.dma_semaphore, #tpu.memory_space<semaphore_mem>> -> memref<!tpu.dma_semaphore, #tpu.memory_space<semaphore_mem>>
    tpu.enqueue_dma source(%109 : memref<1x128xf32, #tpu.memory_space<any>>) target(%110 : memref<1x128xf32, #tpu.memory_space<vmem>>) target_semaphore(%112 : memref<!tpu.dma_semaphore, #tpu.memory_space<semaphore_mem>>)
    %c0_i32_64 = arith.constant 0 : i32
    %c16_i32_65 = arith.constant 16 : i32
    %113 = arith.addi %c0_i32_64, %c16_i32_65 : i32
    %c1_i32_66 = arith.constant 1 : i32
    scf.for %arg6 = %c0_i32_64 to %113 step %c1_i32_66  : i32 {
      %c1_i32_71 = arith.constant 1 : i32
      %118 = arith.muli %arg6, %c1_i32_71 : i32
      %c0_i32_72 = arith.constant 0 : i32
      %119 = arith.addi %c0_i32_72, %118 : i32
      %c16_i32_73 = arith.constant 16 : i32
      %c0_i32_74 = arith.constant 0 : i32
      %120 = arith.cmpi eq, %c16_i32_73, %c0_i32_74 : i32
      %c1_i32_75 = arith.constant 1 : i32
      %121 = arith.select %120, %c1_i32_75, %c16_i32_73 : i32
      %122 = arith.remsi %119, %121 : i32
      %c0_i32_76 = arith.constant 0 : i32
      %123 = arith.cmpi ne, %122, %c0_i32_76 : i32
      %c0_i32_77 = arith.constant 0 : i32
      %124 = arith.cmpi slt, %122, %c0_i32_77 : i32
      %c0_i32_78 = arith.constant 0 : i32
      %125 = arith.cmpi slt, %121, %c0_i32_78 : i32
      %126 = arith.xori %124, %125 : i1
      %127 = arith.andi %126, %123 : i1
      %128 = arith.addi %122, %121 : i32
      %129 = arith.select %127, %128, %122 : i32
      %c0_i32_79 = arith.constant 0 : i32
      %c0_i32_80 = arith.constant 0 : i32
      %130 = tpu.memref_slice %arg2[%c0_i32_79, %c0_i32_80] : memref<256x128xf32, #tpu.memory_space<any>> -> memref<1x128xf32, #tpu.memory_space<any>>
      %c0_i32_81 = arith.constant 0 : i32
      %131 = tpu.memref_slice %arg4[%119, %c0_i32_81] : memref<16x128xf32, #tpu.memory_space<vmem>> -> memref<1x128xf32, #tpu.memory_space<vmem>>
      %132 = tpu.memref_slice %arg5[%129] : memref<16x!tpu.dma_semaphore, #tpu.memory_space<semaphore_mem>> -> memref<1x!tpu.dma_semaphore, #tpu.memory_space<semaphore_mem>>
      %133 = tpu.memref_squeeze %132 : memref<1x!tpu.dma_semaphore, #tpu.memory_space<semaphore_mem>> -> memref<!tpu.dma_semaphore, #tpu.memory_space<semaphore_mem>>
      tpu.wait_dma2 semaphore(%133 : memref<!tpu.dma_semaphore, #tpu.memory_space<semaphore_mem>>) src(%130 : memref<1x128xf32, #tpu.memory_space<any>>) dst(%131 : memref<1x128xf32, #tpu.memory_space<vmem>>)
      %c16_i32_82 = arith.constant 16 : i32
      %134 = arith.addi %119, %c16_i32_82 : i32
      %c16_i32_83 = arith.constant 16 : i32
      %135 = arith.cmpi slt, %134, %c16_i32_83 : i32
      %136 = arith.extui %135 : i1 to i32
      %c0_i32_84 = arith.constant 0 : i32
      %137 = arith.cmpi ne, %136, %c0_i32_84 : i32
      scf.if %137 {
        %c16_i32_85 = arith.constant 16 : i32
        %138 = arith.addi %119, %c16_i32_85 : i32
        %139 = arith.addi %0, %138 : i32
        %140 = arith.index_cast %139 : i32 to index
        %141 = memref.load %arg1[%140] : memref<16xi32, #tpu.memory_space<smem>>
        %c16_i32_86 = arith.constant 16 : i32
        %c0_i32_87 = arith.constant 0 : i32
        %142 = arith.cmpi eq, %c16_i32_86, %c0_i32_87 : i32
        %c1_i32_88 = arith.constant 1 : i32
        %143 = arith.select %142, %c1_i32_88, %c16_i32_86 : i32
        %144 = arith.remsi %138, %143 : i32
        %c0_i32_89 = arith.constant 0 : i32
        %145 = arith.cmpi ne, %144, %c0_i32_89 : i32
        %c0_i32_90 = arith.constant 0 : i32
        %146 = arith.cmpi slt, %144, %c0_i32_90 : i32
        %c0_i32_91 = arith.constant 0 : i32
        %147 = arith.cmpi slt, %143, %c0_i32_91 : i32
        %148 = arith.xori %146, %147 : i1
        %149 = arith.andi %148, %145 : i1
        %150 = arith.addi %144, %143 : i32
        %151 = arith.select %149, %150, %144 : i32
        %c0_i32_92 = arith.constant 0 : i32
        %152 = tpu.memref_slice %arg2[%141, %c0_i32_92] : memref<256x128xf32, #tpu.memory_space<any>> -> memref<1x128xf32, #tpu.memory_space<any>>
        %c0_i32_93 = arith.constant 0 : i32
        %153 = tpu.memref_slice %arg4[%138, %c0_i32_93] : memref<16x128xf32, #tpu.memory_space<vmem>> -> memref<1x128xf32, #tpu.memory_space<vmem>>
        %154 = tpu.memref_slice %arg5[%151] : memref<16x!tpu.dma_semaphore, #tpu.memory_space<semaphore_mem>> -> memref<1x!tpu.dma_semaphore, #tpu.memory_space<semaphore_mem>>
        %155 = tpu.memref_squeeze %154 : memref<1x!tpu.dma_semaphore, #tpu.memory_space<semaphore_mem>> -> memref<!tpu.dma_semaphore, #tpu.memory_space<semaphore_mem>>
        tpu.enqueue_dma source(%152 : memref<1x128xf32, #tpu.memory_space<any>>) target(%153 : memref<1x128xf32, #tpu.memory_space<vmem>>) target_semaphore(%155 : memref<!tpu.dma_semaphore, #tpu.memory_space<semaphore_mem>>)
      } else {
      }
    }
    %c16_i32_67 = arith.constant 16 : i32
    %c0 = arith.constant 0 : index
    %c0_68 = arith.constant 0 : index
    %114 = vector.load %arg4[%c0, %c0_68] : memref<16x128xf32, #tpu.memory_space<vmem>>, vector<16x128xf32>
    %cst = arith.constant 11.3137083 : f32
    %115 = vector.broadcast %cst : f32 to vector<16x128xf32>
    %116 = arith.mulf %114, %115 : vector<16x128xf32>
    %c0_69 = arith.constant 0 : index
    %c0_70 = arith.constant 0 : index
    %117 = vector.load %arg3[%c0_69, %c0_70] : memref<16x128xf32, #tpu.memory_space<vmem>>, vector<16x128xf32>
    tpu.vector_store %arg3[%c0_69, %c0_70], %116 {strides = array<i32>} : memref<16x128xf32, #tpu.memory_space<vmem>>, vector<16x128xf32>,
    return
  }
  func.func @transform_1(%arg0: i32, %arg1: memref<16xi32, #tpu.memory_space<smem>>) -> (i32, i32) {
    %c0_i32 = arith.constant 0 : i32
    %c0_i32_0 = arith.constant 0 : i32
    return %arg0, %c0_i32 : i32, i32
  }
}

</mosaic_0001>

<bundles_post_ra>
// kernel: tpu_custom_call.1
= control target key start
LH: loop header
LB: loop body
LE: loop exit
PB: predicated region body
PF: predicated region fallthrough
CT: control target
= control target key end

     0   :  { %s1022_s9 = smov [#allocation5]   ;;  %s1341_s0 = inlined_call_operand.hbm [shape: s32[16], index: 0, kind: input, shape index: {}]   ;;  %s1342_s1 = inlined_call_operand.hbm [shape: f32[256,128], index: 1, kind: input, shape index: {}]   ;;  %s1343_s2 = inlined_call_operand.hbm [shape: f32[16,128], index: 2, kind: output, shape index: {}]  }
   0x1   :  { %8 = dma.hbm_to_smem %s1341_s0, 16, %s1022_s9, [#allocation4] }
   0x2   :  { %1012 = dma.done.wait [#allocation4], 16 }
   0x3   :  { %1013 = vsyncadd [#allocation4], 4294967280 }
   0x4   :  { %10 = sfence }
   0x5   :  { %11 = vsyncpa [#allocation7], 0  ;;  %s13_s12 = sld [smem:[#allocation5]]  ;;  %s1023_s13 = smov [#allocation2]  }
   0x6   :  { %s23_s14 = sshll.u32 %s1023_s13, 4  ;;  %s1060_s15 = sld [smem:[#allocation5 + $0x1]]  ;;  %s1062_s14 = int_to_ptr.vmem [resolvable:$true] %s23_s14 }
   0x7   :  { %s1024_s16 = smov [#allocation2 + $0x1]   ;;  %s1064_s18 = sld [smem:[#allocation5 + $0x2]] }
   0x8   :  { %s40_s17 = sshll.u32 %s1024_s16, 4  ;;  %s1025_s19 = smov [#allocation2 + $0x2]   ;;  %s1066_s17 = int_to_ptr.vmem [resolvable:$true] %s40_s17 }
   0x9   :  { %s57_s0 = sshll.u32 %s1025_s19, 4  ;;  %s1068_s20 = sld [smem:[#allocation5 + $0x3]]  ;;  %s1070_s0 = int_to_ptr.vmem [resolvable:$true] %s57_s0 }
   0xa   :  { %s1079_s29 = scalar_lea.hbm %s1342_s1, 4096 }
   0xb   :  { %s514_s21 = sshll.u32 %s13_s12, 4 }
   0xc   :  { %s15_s24 = scalar_lea.hbm %s1342_s1, %s514_s21  ;;  %s516_s25 = sshll.u32 %s1060_s15, 4 }
   0xd   :  { %s610_s26 = scalar_lea.hbm %s15_s24, 16  ;;  %p613_p1 = scmp.lt.s32.totalorder %s15_s24, %s1342_s1 }
   0xe   :  { %p611_p0 = scmp.ne.s32.totalorder %s15_s24, %s610_s26  ;;  %p614_p2 = scmp.lt.s32.totalorder %s1079_s29, %s610_s26 }
  0x10   :  { %p615_p3 = por %p614_p2, %p613_p1 }
  0x12   :  { %p616_p4 = pnand %p615_p3, %p611_p0 }
  0x14   :  { %619 = shalt.err (!%p616_p4)  }
  0x15   :  { %s620_s4 = scalar_lea.vmem %s1062_s14, 16  ;;  %s1088_s5 = scalar_lea.vmem %s1062_s14, 256 }
  0x16   :  { %p621_p5 = scmp.ne.s32.totalorder %s1062_s14, %s620_s4  ;;  %p625_p6 = scmp.lt.s32.totalorder %s1062_s14, %s1062_s14 }
  0x17   :  { %p626_p7 = scmp.lt.s32.totalorder %s1088_s5, %s620_s4 }
  0x19   :  { %p627_p8 = por %p626_p7, %p625_p6 }
  0x1b   :  { %p628_p9 = pnand %p627_p8, %p621_p5 }
  0x1d   :  { %631 = shalt.err (!%p628_p9)  }
  0x1e   :  { %26 = dma.hbm_to_vmem [thread:$0]  %s15_s24, 16, %s1062_s14, [#allocation3] }
  0x1f   :  { %s30_s8 = scalar_lea.hbm %s1342_s1, %s516_s25  ;;  %s518_s9 = sshll.u32 %s1064_s18, 4 }
  0x20   :  { %s632_s10 = scalar_lea.hbm %s30_s8, 16  ;;  %p635_p11 = scmp.lt.s32.totalorder %s30_s8, %s1342_s1 }
  0x21   :  { %p633_p10 = scmp.ne.s32.totalorder %s30_s8, %s632_s10  ;;  %p636_p12 = scmp.lt.s32.totalorder %s1079_s29, %s632_s10 }
  0x23   :  { %p637_p13 = por %p636_p12, %p635_p11 }
  0x25   :  { %p638_p0 = pnand %p637_p13, %p633_p10 }
  0x27   :  { %641 = shalt.err (!%p638_p0)  }
  0x28   :  { %s642_s13 = scalar_lea.vmem %s1066_s17, 16  ;;  %p647_p2 = scmp.lt.s32.totalorder %s1066_s17, %s1062_s14 }
  0x29   :  { %p643_p1 = scmp.ne.s32.totalorder %s1066_s17, %s642_s13  ;;  %p648_p3 = scmp.lt.s32.totalorder %s1088_s5, %s642_s13 }
  0x2b   :  { %p649_p4 = por %p648_p3, %p647_p2 }
  0x2d   :  { %p650_p5 = pnand %p649_p4, %p643_p1 }
  0x2f   :  { %653 = shalt.err (!%p650_p5)  }
  0x30   :  { %43 = dma.hbm_to_vmem [thread:$0]  %s30_s8, 16, %s1066_s17, [#allocation3 + $0x1] }
  0x31   :  { %s47_s18 = scalar_lea.hbm %s1342_s1, %s518_s9  ;;  %s520_s19 = sshll.u32 %s1068_s20, 4 }
  0x32   :  { %s654_s21 = scalar_lea.hbm %s47_s18, 16  ;;  %p657_p7 = scmp.lt.s32.totalorder %s47_s18, %s1342_s1 }
  0x33   :  { %p655_p6 = scmp.ne.s32.totalorder %s47_s18, %s654_s21  ;;  %p658_p8 = scmp.lt.s32.totalorder %s1079_s29, %s654_s21 }
  0x35   :  { %p659_p9 = por %p658_p8, %p657_p7 }
  0x37   :  { %p660_p10 = pnand %p659_p9, %p655_p6 }
  0x39   :  { %663 = shalt.err (!%p660_p10)  }
  0x3a   :  { %s664_s17 = scalar_lea.vmem %s1070_s0, 16  ;;  %p669_p12 = scmp.lt.s32.totalorder %s1070_s0, %s1062_s14 }
  0x3b   :  { %p665_p11 = scmp.ne.s32.totalorder %s1070_s0, %s664_s17  ;;  %p670_p13 = scmp.lt.s32.totalorder %s1088_s5, %s664_s17 }
  0x3d   :  { %p671_p0 = por %p670_p13, %p669_p12 }
  0x3f   :  { %p672_p1 = pnand %p671_p0, %p665_p11 }
  0x41   :  { %675 = shalt.err (!%p672_p1)  }
  0x42   :  { %60 = dma.hbm_to_vmem [thread:$0]  %s47_s18, 16, %s1070_s0, [#allocation3 + $0x2] }
  0x43   :  { %s64_s25 = scalar_lea.hbm %s1342_s1, %s520_s19  ;;  %s1026_s26 = smov [#allocation2 + $0x3]  }
  0x44   :  { %s74_s27 = sshll.u32 %s1026_s26, 4  ;;  %s521_s28 = sld [smem:[#allocation5 + $0x4]]  ;;  %s75_s27 = int_to_ptr.vmem [resolvable:$true] %s74_s27 }
  0x45   :  { %s676_s30 = scalar_lea.hbm %s64_s25, 16  ;;  %p679_p3 = scmp.lt.s32.totalorder %s64_s25, %s1342_s1 }
  0x46   :  { %p677_p2 = scmp.ne.s32.totalorder %s64_s25, %s676_s30  ;;  %p680_p4 = scmp.lt.s32.totalorder %s1079_s29, %s676_s30 }
  0x48   :  { %p681_p5 = por %p680_p4, %p679_p3 }
  0x4a   :  { %p682_p6 = pnand %p681_p5, %p677_p2 }
  0x4c   :  { %685 = shalt.err (!%p682_p6)  }
  0x4d   :  { %s686_s6 = scalar_lea.vmem %s75_s27, 16  ;;  %p691_p8 = scmp.lt.s32.totalorder %s75_s27, %s1062_s14 }
  0x4e   :  { %p687_p7 = scmp.ne.s32.totalorder %s75_s27, %s686_s6  ;;  %p692_p9 = scmp.lt.s32.totalorder %s1088_s5, %s686_s6 }
  0x50   :  { %p693_p10 = por %p692_p9, %p691_p8 }
  0x52   :  { %p694_p11 = pnand %p693_p10, %p687_p7 }
  0x54   :  { %697 = shalt.err (!%p694_p11)  }
  0x55   :  { %77 = dma.hbm_to_vmem [thread:$0]  %s64_s25, 16, %s75_s27, [#allocation3 + $0x3] }
  0x56   :  { %s1027_s0 = smov [#allocation2 + $0x4]   ;;  %s523_s8 = sld [smem:[#allocation5 + $0x5]] }
  0x57   :  { %s91_s7 = sshll.u32 %s1027_s0, 4  ;;  %s1028_s9 = smov [#allocation2 + $0x5]   ;;  %s92_s7 = int_to_ptr.vmem [resolvable:$true] %s91_s7 }
  0x58   :  { %s108_s10 = sshll.u32 %s1028_s9, 4  ;;  %s1131_s11 = sld [smem:[#allocation5 + $0x6]]  ;;  %s1133_s10 = int_to_ptr.vmem [resolvable:$true] %s108_s10 }
  0x59   :  { %s522_s12 = sshll.u32 %s521_s28, 4 }
  0x5a   :  { %s81_s16 = scalar_lea.hbm %s1342_s1, %s522_s12 }
  0x5b   :  { %s698_s18 = scalar_lea.hbm %s81_s16, 16  ;;  %p701_p13 = scmp.lt.s32.totalorder %s81_s16, %s1342_s1 }
  0x5c   :  { %p699_p12 = scmp.ne.s32.totalorder %s81_s16, %s698_s18  ;;  %p702_p0 = scmp.lt.s32.totalorder %s1079_s29, %s698_s18 }
  0x5e   :  { %p703_p1 = por %p702_p0, %p701_p13 }
  0x60   :  { %p704_p2 = pnand %p703_p1, %p699_p12 }
  0x62   :  { %707 = shalt.err (!%p704_p2)  }
  0x63   :  { %s708_s22 = scalar_lea.vmem %s92_s7, 16  ;;  %p713_p4 = scmp.lt.s32.totalorder %s92_s7, %s1062_s14 }
  0x64   :  { %p709_p3 = scmp.ne.s32.totalorder %s92_s7, %s708_s22  ;;  %p714_p5 = scmp.lt.s32.totalorder %s1088_s5, %s708_s22 }
  0x66   :  { %p715_p6 = por %p714_p5, %p713_p4 }
  0x68   :  { %p716_p7 = pnand %p715_p6, %p709_p3 }
  0x6a   :  { %719 = shalt.err (!%p716_p7)  }
  0x6b   :  { %94 = dma.hbm_to_vmem [thread:$0]  %s81_s16, 16, %s92_s7, [#allocation3 + $0x4] }
  0x6c   :  { %s524_s23 = sshll.u32 %s523_s8, 4  ;;  %s1029_s17 = smov [#allocation2 + $0x6]  }
  0x6d   :  { %s125_s20 = sshll.u32 %s1029_s17, 4  ;;  %s98_s26 = scalar_lea.hbm %s1342_s1, %s524_s23  ;;  %s1147_s20 = int_to_ptr.vmem [resolvable:$true] %s125_s20 }
  0x6e   :  { %s720_s27 = scalar_lea.hbm %s98_s26, 16  ;;  %p723_p9 = scmp.lt.s32.totalorder %s98_s26, %s1342_s1 }
  0x6f   :  { %p721_p8 = scmp.ne.s32.totalorder %s98_s26, %s720_s27  ;;  %p724_p10 = scmp.lt.s32.totalorder %s1079_s29, %s720_s27 }
  0x71   :  { %p725_p11 = por %p724_p10, %p723_p9 }
  0x73   :  { %p726_p12 = pnand %p725_p11, %p721_p8 }
  0x75   :  { %729 = shalt.err (!%p726_p12)  }
  0x76   :  { %s730_s3 = scalar_lea.vmem %s1133_s10, 16  ;;  %p735_p0 = scmp.lt.s32.totalorder %s1133_s10, %s1062_s14 }
  0x77   :  { %p731_p13 = scmp.ne.s32.totalorder %s1133_s10, %s730_s3  ;;  %p736_p1 = scmp.lt.s32.totalorder %s1088_s5, %s730_s3 }
  0x79   :  { %p737_p2 = por %p736_p1, %p735_p0 }
  0x7b   :  { %p738_p3 = pnand %p737_p2, %p731_p13 }
  0x7d   :  { %741 = shalt.err (!%p738_p3)  }
  0x7e   :  { %111 = dma.hbm_to_vmem [thread:$0]  %s98_s26, 16, %s1133_s10, [#allocation3 + $0x5] }
  0x7f   :  { %s526_s4 = sshll.u32 %s1131_s11, 4  ;;  %s527_s6 = sld [smem:[#allocation5 + $0x7]] }
  0x80   :  { %s115_s8 = scalar_lea.hbm %s1342_s1, %s526_s4 }
  0x81   :  { %s742_s9 = scalar_lea.hbm %s115_s8, 16  ;;  %p745_p5 = scmp.lt.s32.totalorder %s115_s8, %s1342_s1 }
  0x82   :  { %p743_p4 = scmp.ne.s32.totalorder %s115_s8, %s742_s9  ;;  %p746_p6 = scmp.lt.s32.totalorder %s1079_s29, %s742_s9 }
  0x84   :  { %p747_p7 = por %p746_p6, %p745_p5 }
  0x86   :  { %p748_p8 = pnand %p747_p7, %p743_p4 }
  0x88   :  { %751 = shalt.err (!%p748_p8)  }
  0x89   :  { %s752_s10 = scalar_lea.vmem %s1147_s20, 16  ;;  %p757_p10 = scmp.lt.s32.totalorder %s1147_s20, %s1062_s14 }
  0x8a   :  { %p753_p9 = scmp.ne.s32.totalorder %s1147_s20, %s752_s10  ;;  %p758_p11 = scmp.lt.s32.totalorder %s1088_s5, %s752_s10 }
  0x8c   :  { %p759_p12 = por %p758_p11, %p757_p10 }
  0x8e   :  { %p760_p13 = pnand %p759_p12, %p753_p9 }
  0x90   :  { %763 = shalt.err (!%p760_p13)  }
  0x91   :  { %128 = dma.hbm_to_vmem [thread:$0]  %s115_s8, 16, %s1147_s20, [#allocation3 + $0x6] }
  0x92   :  { %s1030_s11 = smov [#allocation2 + $0x7]   ;;  %s529_s16 = sld [smem:[#allocation5 + $0x8]] }
  0x93   :  { %s142_s15 = sshll.u32 %s1030_s11, 4  ;;  %s1031_s18 = smov [#allocation2 + $0x8]   ;;  %s143_s15 = int_to_ptr.vmem [resolvable:$true] %s142_s15 }
  0x94   :  { %s159_s19 = sshll.u32 %s1031_s18, 4  ;;  %s1173_s21 = sld [smem:[#allocation5 + $0x9]]  ;;  %s1175_s19 = int_to_ptr.vmem [resolvable:$true] %s159_s19 }
  0x95   :  { %s528_s22 = sshll.u32 %s527_s6, 4 }
  0x96   :  { %s132_s24 = scalar_lea.hbm %s1342_s1, %s528_s22 }
  0x97   :  { %s764_s25 = scalar_lea.hbm %s132_s24, 16  ;;  %p767_p1 = scmp.lt.s32.totalorder %s132_s24, %s1342_s1 }
  0x98   :  { %p765_p0 = scmp.ne.s32.totalorder %s132_s24, %s764_s25  ;;  %p768_p2 = scmp.lt.s32.totalorder %s1079_s29, %s764_s25 }
  0x9a   :  { %p769_p3 = por %p768_p2, %p767_p1 }
  0x9c   :  { %p770_p4 = pnand %p769_p3, %p765_p0 }
  0x9e   :  { %773 = shalt.err (!%p770_p4)  }
  0x9f   :  { %s774_s20 = scalar_lea.vmem %s143_s15, 16  ;;  %p779_p6 = scmp.lt.s32.totalorder %s143_s15, %s1062_s14 }
  0xa0   :  { %p775_p5 = scmp.ne.s32.totalorder %s143_s15, %s774_s20  ;;  %p780_p7 = scmp.lt.s32.totalorder %s1088_s5, %s774_s20 }
  0xa2   :  { %p781_p8 = por %p780_p7, %p779_p6 }
  0xa4   :  { %p782_p9 = pnand %p781_p8, %p775_p5 }
  0xa6   :  { %785 = shalt.err (!%p782_p9)  }
  0xa7   :  { %145 = dma.hbm_to_vmem [thread:$0]  %s132_s24, 16, %s143_s15, [#allocation3 + $0x7] }
  0xa8   :  { %s530_s28 = sshll.u32 %s529_s16, 4  ;;  %s1032_s30 = smov [#allocation2 + $0x9]  }
  0xa9   :  { %s176_s3 = sshll.u32 %s1032_s30, 4  ;;  %s149_s0 = scalar_lea.hbm %s1342_s1, %s530_s28  ;;  %s1189_s3 = int_to_ptr.vmem [resolvable:$true] %s176_s3 }
  0xaa   :  { %s786_s7 = scalar_lea.hbm %s149_s0, 16  ;;  %p789_p11 = scmp.lt.s32.totalorder %s149_s0, %s1342_s1 }
  0xab   :  { %p787_p10 = scmp.ne.s32.totalorder %s149_s0, %s786_s7  ;;  %p790_p12 = scmp.lt.s32.totalorder %s1079_s29, %s786_s7 }
  0xad   :  { %p791_p13 = por %p790_p12, %p789_p11 }
  0xaf   :  { %p792_p0 = pnand %p791_p13, %p787_p10 }
  0xb1   :  { %795 = shalt.err (!%p792_p0)  }
  0xb2   :  { %s796_s12 = scalar_lea.vmem %s1175_s19, 16  ;;  %p801_p2 = scmp.lt.s32.totalorder %s1175_s19, %s1062_s14 }
  0xb3   :  { %p797_p1 = scmp.ne.s32.totalorder %s1175_s19, %s796_s12  ;;  %p802_p3 = scmp.lt.s32.totalorder %s1088_s5, %s796_s12 }
  0xb5   :  { %p803_p4 = por %p802_p3, %p801_p2 }
  0xb7   :  { %p804_p5 = pnand %p803_p4, %p797_p1 }
  0xb9   :  { %807 = shalt.err (!%p804_p5)  }
  0xba   :  { %162 = dma.hbm_to_vmem [thread:$0]  %s149_s0, 16, %s1175_s19, [#allocation3 + $0x8] }
  0xbb   :  { %s532_s13 = sshll.u32 %s1173_s21, 4  ;;  %s533_s10 = sld [smem:[#allocation5 + $0xa]] }
  0xbc   :  { %s166_s16 = scalar_lea.hbm %s1342_s1, %s532_s13 }
  0xbd   :  { %s808_s18 = scalar_lea.hbm %s166_s16, 16  ;;  %p811_p7 = scmp.lt.s32.totalorder %s166_s16, %s1342_s1 }
  0xbe   :  { %p809_p6 = scmp.ne.s32.totalorder %s166_s16, %s808_s18  ;;  %p812_p8 = scmp.lt.s32.totalorder %s1079_s29, %s808_s18 }
  0xc0   :  { %p813_p9 = por %p812_p8, %p811_p7 }
  0xc2   :  { %p814_p10 = pnand %p813_p9, %p809_p6 }
  0xc4   :  { %817 = shalt.err (!%p814_p10)  }
  0xc5   :  { %s818_s19 = scalar_lea.vmem %s1189_s3, 16  ;;  %p823_p12 = scmp.lt.s32.totalorder %s1189_s3, %s1062_s14 }
  0xc6   :  { %p819_p11 = scmp.ne.s32.totalorder %s1189_s3, %s818_s19  ;;  %p824_p13 = scmp.lt.s32.totalorder %s1088_s5, %s818_s19 }
  0xc8   :  { %p825_p0 = por %p824_p13, %p823_p12 }
  0xca   :  { %p826_p1 = pnand %p825_p0, %p819_p11 }
  0xcc   :  { %829 = shalt.err (!%p826_p1)  }
  0xcd   :  { %179 = dma.hbm_to_vmem [thread:$0]  %s166_s16, 16, %s1189_s3, [#allocation3 + $0x9] }
  0xce   :  { %s1033_s21 = smov [#allocation2 + $0xa]   ;;  %s535_s24 = sld [smem:[#allocation5 + $0xb]] }
  0xcf   :  { %s193_s17 = sshll.u32 %s1033_s21, 4  ;;  %s1034_s25 = smov [#allocation2 + $0xb]   ;;  %s194_s17 = int_to_ptr.vmem [resolvable:$true] %s193_s17 }
  0xd0   :  { %s210_s26 = sshll.u32 %s1034_s25, 4  ;;  %s1215_s27 = sld [smem:[#allocation5 + $0xc]]  ;;  %s1217_s26 = int_to_ptr.vmem [resolvable:$true] %s210_s26 }
  0xd1   :  { %s534_s20 = sshll.u32 %s533_s10, 4 }
  0xd2   :  { %s183_s4 = scalar_lea.hbm %s1342_s1, %s534_s20 }
  0xd3   :  { %s830_s6 = scalar_lea.hbm %s183_s4, 16  ;;  %p833_p3 = scmp.lt.s32.totalorder %s183_s4, %s1342_s1 }
  0xd4   :  { %p831_p2 = scmp.ne.s32.totalorder %s183_s4, %s830_s6  ;;  %p834_p4 = scmp.lt.s32.totalorder %s1079_s29, %s830_s6 }
  0xd6   :  { %p835_p5 = por %p834_p4, %p833_p3 }
  0xd8   :  { %p836_p6 = pnand %p835_p5, %p831_p2 }
  0xda   :  { %839 = shalt.err (!%p836_p6)  }
  0xdb   :  { %s840_s3 = scalar_lea.vmem %s194_s17, 16  ;;  %p845_p8 = scmp.lt.s32.totalorder %s194_s17, %s1062_s14 }
  0xdc   :  { %p841_p7 = scmp.ne.s32.totalorder %s194_s17, %s840_s3  ;;  %p846_p9 = scmp.lt.s32.totalorder %s1088_s5, %s840_s3 }
  0xde   :  { %p847_p10 = por %p846_p9, %p845_p8 }
  0xe0   :  { %p848_p11 = pnand %p847_p10, %p841_p7 }
  0xe2   :  { %851 = shalt.err (!%p848_p11)  }
  0xe3   :  { %196 = dma.hbm_to_vmem [thread:$0]  %s183_s4, 16, %s194_s17, [#allocation3 + $0xa] }
  0xe4   :  { %s536_s8 = sshll.u32 %s535_s24, 4  ;;  %s1035_s9 = smov [#allocation2 + $0xc]  }
  0xe5   :  { %s227_s12 = sshll.u32 %s1035_s9, 4  ;;  %s200_s11 = scalar_lea.hbm %s1342_s1, %s536_s8  ;;  %s1231_s12 = int_to_ptr.vmem [resolvable:$true] %s227_s12 }
  0xe6   :  { %s852_s15 = scalar_lea.hbm %s200_s11, 16  ;;  %p855_p13 = scmp.lt.s32.totalorder %s200_s11, %s1342_s1 }
  0xe7   :  { %p853_p12 = scmp.ne.s32.totalorder %s200_s11, %s852_s15  ;;  %p856_p0 = scmp.lt.s32.totalorder %s1079_s29, %s852_s15 }
  0xe9   :  { %p857_p1 = por %p856_p0, %p855_p13 }
  0xeb   :  { %p858_p2 = pnand %p857_p1, %p853_p12 }
  0xed   :  { %861 = shalt.err (!%p858_p2)  }
  0xee   :  { %s862_s22 = scalar_lea.vmem %s1217_s26, 16  ;;  %p867_p4 = scmp.lt.s32.totalorder %s1217_s26, %s1062_s14 }
  0xef   :  { %p863_p3 = scmp.ne.s32.totalorder %s1217_s26, %s862_s22  ;;  %p868_p5 = scmp.lt.s32.totalorder %s1088_s5, %s862_s22 }
  0xf1   :  { %p869_p6 = por %p868_p5, %p867_p4 }
  0xf3   :  { %p870_p7 = pnand %p869_p6, %p863_p3 }
  0xf5   :  { %873 = shalt.err (!%p870_p7)  }
  0xf6   :  { %213 = dma.hbm_to_vmem [thread:$0]  %s200_s11, 16, %s1217_s26, [#allocation3 + $0xb] }
  0xf7   :  { %s538_s23 = sshll.u32 %s1215_s27, 4  ;;  %s539_s19 = sld [smem:[#allocation5 + $0xd]] }
  0xf8   :  { %s217_s24 = scalar_lea.hbm %s1342_s1, %s538_s23 }
  0xf9   :  { %s874_s25 = scalar_lea.hbm %s217_s24, 16  ;;  %p877_p9 = scmp.lt.s32.totalorder %s217_s24, %s1342_s1 }
  0xfa   :  { %p875_p8 = scmp.ne.s32.totalorder %s217_s24, %s874_s25  ;;  %p878_p10 = scmp.lt.s32.totalorder %s1079_s29, %s874_s25 }
  0xfc   :  { %p879_p11 = por %p878_p10, %p877_p9 }
  0xfe   :  { %p880_p12 = pnand %p879_p11, %p875_p8 }
 0x100   :  { %883 = shalt.err (!%p880_p12)  }
 0x101   :  { %s884_s26 = scalar_lea.vmem %s1231_s12, 16  ;;  %p889_p0 = scmp.lt.s32.totalorder %s1231_s12, %s1062_s14 }
 0x102   :  { %p885_p13 = scmp.ne.s32.totalorder %s1231_s12, %s884_s26  ;;  %p890_p1 = scmp.lt.s32.totalorder %s1088_s5, %s884_s26 }
 0x104   :  { %p891_p2 = por %p890_p1, %p889_p0 }
 0x106   :  { %p892_p3 = pnand %p891_p2, %p885_p13 }
 0x108   :  { %895 = shalt.err (!%p892_p3)  }
 0x109   :  { %230 = dma.hbm_to_vmem [thread:$0]  %s217_s24, 16, %s1231_s12, [#allocation3 + $0xc] }
 0x10a   :  { %s1036_s27 = smov [#allocation2 + $0xd]   ;;  %s541_s4 = sld [smem:[#allocation5 + $0xe]] }
 0x10b   :  { %s244_s30 = sshll.u32 %s1036_s27, 4  ;;  %s1037_s6 = smov [#allocation2 + $0xe]   ;;  %s245_s30 = int_to_ptr.vmem [resolvable:$true] %s244_s30 }
 0x10c   :  { %s261_s0 = sshll.u32 %s1037_s6, 4  ;;  %s1257_s7 = sld [smem:[#allocation5 + $0xf]]  ;;  %s1259_s0 = int_to_ptr.vmem [resolvable:$true] %s261_s0 }
 0x10d   :  { %s540_s3 = sshll.u32 %s539_s19, 4 }
 0x10e   :  { %s234_s13 = scalar_lea.hbm %s1342_s1, %s540_s3 }
 0x10f   :  { %s896_s10 = scalar_lea.hbm %s234_s13, 16  ;;  %p899_p5 = scmp.lt.s32.totalorder %s234_s13, %s1342_s1 }
 0x110   :  { %p897_p4 = scmp.ne.s32.totalorder %s234_s13, %s896_s10  ;;  %p900_p6 = scmp.lt.s32.totalorder %s1079_s29, %s896_s10 }
 0x112   :  { %p901_p7 = por %p900_p6, %p899_p5 }
 0x114   :  { %p902_p8 = pnand %p901_p7, %p897_p4 }
 0x116   :  { %905 = shalt.err (!%p902_p8)  }
 0x117   :  { %s906_s12 = scalar_lea.vmem %s245_s30, 16  ;;  %p911_p10 = scmp.lt.s32.totalorder %s245_s30, %s1062_s14 }
 0x118   :  { %p907_p9 = scmp.ne.s32.totalorder %s245_s30, %s906_s12  ;;  %p912_p11 = scmp.lt.s32.totalorder %s1088_s5, %s906_s12 }
 0x11a   :  { %p913_p12 = por %p912_p11, %p911_p10 }
 0x11c   :  { %p914_p13 = pnand %p913_p12, %p907_p9 }
 0x11e   :  { %917 = shalt.err (!%p914_p13)  }
 0x11f   :  { %247 = dma.hbm_to_vmem [thread:$0]  %s234_s13, 16, %s245_s30, [#allocation3 + $0xd] }
 0x120   :  { %s542_s16 = sshll.u32 %s541_s4, 4  ;;  %s1038_s18 = smov [#allocation2 + $0xf]  }
 0x121   :  { %s278_s22 = sshll.u32 %s1038_s18, 4  ;;  %s251_s21 = scalar_lea.hbm %s1342_s1, %s542_s16  ;;  %s1273_s22 = int_to_ptr.vmem [resolvable:$true] %s278_s22 }
 0x122   :  { %s918_s17 = scalar_lea.hbm %s251_s21, 16  ;;  %p921_p1 = scmp.lt.s32.totalorder %s251_s21, %s1342_s1 }
 0x123   :  { %p919_p0 = scmp.ne.s32.totalorder %s251_s21, %s918_s17  ;;  %p922_p2 = scmp.lt.s32.totalorder %s1079_s29, %s918_s17 }
 0x125   :  { %p923_p3 = por %p922_p2, %p921_p1 }
 0x127   :  { %p924_p4 = pnand %p923_p3, %p919_p0 }
 0x129   :  { %927 = shalt.err (!%p924_p4)  }
 0x12a   :  { %s928_s20 = scalar_lea.vmem %s1259_s0, 16  ;;  %p933_p6 = scmp.lt.s32.totalorder %s1259_s0, %s1062_s14 }
 0x12b   :  { %p929_p5 = scmp.ne.s32.totalorder %s1259_s0, %s928_s20  ;;  %p934_p7 = scmp.lt.s32.totalorder %s1088_s5, %s928_s20 }
 0x12d   :  { %p935_p8 = por %p934_p7, %p933_p6 }
 0x12f   :  { %p936_p9 = pnand %p935_p8, %p929_p5 }
 0x131   :  { %939 = shalt.err (!%p936_p9)  }
 0x132   :  { %264 = dma.hbm_to_vmem [thread:$0]  %s251_s21, 16, %s1259_s0, [#allocation3 + $0xe] }
 0x133   :  { %s544_s28 = sshll.u32 %s1257_s7, 4 }
 0x134   :  { %s268_s30 = scalar_lea.hbm %s1342_s1, %s544_s28 }
 0x135   :  { %s940_s4 = scalar_lea.hbm %s268_s30, 16  ;;  %p943_p11 = scmp.lt.s32.totalorder %s268_s30, %s1342_s1 }
 0x136   :  { %p941_p10 = scmp.ne.s32.totalorder %s268_s30, %s940_s4  ;;  %p944_p12 = scmp.lt.s32.totalorder %s1079_s29, %s940_s4 }
 0x138   :  { %p945_p13 = por %p944_p12, %p943_p11 }
 0x13a   :  { %p946_p0 = pnand %p945_p13, %p941_p10 }
 0x13c   :  { %949 = shalt.err (!%p946_p0)  }
 0x13d   :  { %s950_s0 = scalar_lea.vmem %s1273_s22, 16  ;;  %p955_p2 = scmp.lt.s32.totalorder %s1273_s22, %s1062_s14 }
 0x13e   :  { %p951_p1 = scmp.ne.s32.totalorder %s1273_s22, %s950_s0  ;;  %p956_p3 = scmp.lt.s32.totalorder %s1088_s5, %s950_s0 }
 0x140   :  { %p957_p4 = por %p956_p3, %p955_p2 }
 0x142   :  { %p958_p5 = pnand %p957_p4, %p951_p1 }
 0x144   :  { %961 = shalt.err (!%p958_p5)  }
 0x145   :  { %281 = dma.hbm_to_vmem [thread:$0]  %s268_s30, 16, %s1273_s22, [#allocation3 + $0xf] }
 0x146   :  { %s1299_s7 = smov 0  }
 0x147 LB: > { %p288_p6 = scmp.lt.s32.totalorder %s1020_s7, 0  ;;  %s289_s8 = ssub.s32 0, %s1020_s7  ;;  %s1020_s7 = sphi %s1299_s7, %s287_s7  }
 0x148   : > { %s545_s9 = smin.u32 %s1020_s7, %s289_s8 }
 0x149   : > { %s291_s13 = sand.u32 15, %s545_s9  }
 0x14a   : > { %s292_s10 = ssub.s32 0, %s291_s13 }
 0x14b   : > { %s1345_s10 = smov (!%p288_p6, %s292_s10), %s291_s13 }
 0x14c   : > { %p547_p7 = scmp.lt.s32.totalorder %s1345_s10, 0  ;;  %s298_s11 = sadd.s32 16, %s1345_s10 }
 0x14e   : > { %s1347_s11 = smov (!%p547_p7, %s298_s11), %s1345_s10 }
 0x14f   : > { %s300_s15 = scalar_lea.sflag [#allocation3], %s1347_s11 }
 0x150   : > { %1014 = dma.done.wait %s300_s15, 16 }
 0x151   : > { %1015 = vsyncadd %s300_s15, 4294967280  ;;  %s1308_s12 = sadd.s32 16, %s1020_s7  ;;  %s506_s24 = scalar_lea.vmem [#allocation2], %s1020_s7 }
 0x152   : > { %p573_p8 = scmp.lt.s32.totalorder %s1308_s12, 16  ;;  %p311_p9 = scmp.lt.s32.totalorder %s1308_s12, 0 }
 0x153   : > { %s312_s16 = ssub.s32 0, %s1308_s12  ;;  %s507_s25 = scalar_lea.vmem %s506_s24, 16 [#allocation2] }
 0x154   : > { %s570_s18 = scalar_select %p573_p8, [#allocation5], [#allocation44] }
 0x155   : > { %s571_s22 = scalar_select %p573_p8, %s1308_s12, 0 }
 0x156   : > { %s549_s23 = smin.u32 %s312_s16, %s1308_s12  ;;  %s334_s20 = sshll.u32 %s507_s25, 4  ;;  %s335_s20 = int_to_ptr.vmem [resolvable:$true] %s334_s20 }
 0x157   : > { %s310_s19 = sld [smem:[%s570_s18 + %s571_s22]]  ;;  %s314_s21 = sand.u32 15, %s549_s23  }
 0x158   : > { %s315_s17 = ssub.s32 0, %s314_s21 }
 0x159   : > { %s1349_s17 = smov (!%p311_p9, %s315_s17), %s314_s21 }
 0x15a   : > { %p551_p10 = scmp.lt.s32.totalorder %s1349_s17, 0  ;;  %s321_s28 = sadd.s32 16, %s1349_s17 }
 0x15c   : > { %s1351_s28 = smov (!%p551_p10, %s321_s28), %s1349_s17 }
 0x15d   : > { %s552_s26 = sshll.u32 %s310_s19, 4  ;;  %s326_s6 = scalar_lea.sflag [#allocation3], %s1351_s28 }
 0x15e   : > { %s324_s4 = scalar_lea.hbm %s1342_s1, %s552_s26 }
 0x15f   : > { %s962_s3 = scalar_lea.hbm %s324_s4, 16  ;;  %p967_p0 = scmp.lt.s32.totalorder %s324_s4, %s1342_s1 }
 0x160   : > { %p963_p11 = scmp.ne.s32.totalorder %s324_s4, %s962_s3  ;;  %p968_p1 = scmp.lt.s32.totalorder %s1079_s29, %s962_s3 }
 0x162   : > { %p964_p12 = pnand %p963_p11, %p573_p8  ;;  %p969_p2 = por %p968_p1, %p967_p0 }
 0x164   : > { %p965_p13 = pneg %p964_p12 }
 0x166   : > { %p970_p3 = pnand %p969_p2, %p965_p13 }
 0x168   : > { %973 = shalt.err (!%p970_p3)  }
 0x169   : > { %s974_s9 = scalar_lea.vmem %s335_s20, 16  ;;  %p981_p7 = scmp.lt.s32.totalorder %s335_s20, %s1062_s14 }
 0x16a   : > { %p975_p4 = scmp.ne.s32.totalorder %s335_s20, %s974_s9  ;;  %p982_p9 = scmp.lt.s32.totalorder %s1088_s5, %s974_s9 }
 0x16c   : > { %p976_p5 = pnand %p975_p4, %p573_p8  ;;  %p983_p10 = por %p982_p9, %p981_p7 }
 0x16e   : > { %p977_p6 = pneg %p976_p5 }
 0x170   : > { %p984_p11 = pnand %p983_p10, %p977_p6 }
 0x172   : > { %987 = shalt.err (!%p984_p11)  }
 0x173   : > { %572 = dma.hbm_to_vmem [thread:$0]  (%p573_p8), %s324_s4, 16, %s335_s20, %s326_s6 }
 0x174   : > { %s287_s7 = sadd.s32 1, %s1020_s7  }
 0x175   : > { %p284_p12 = scmp.ge.s32.totalorder %s287_s7, 16  }
 0x176   :  { %v338_v0 = vld [vmem:[#allocation2] sm:$0xff] (%p284_p12)  ;;  %v339_v1 = vld [vmem:[#allocation2 + $0x8] sm:$0xff] (%p284_p12)  ;;  %s1039_s13 = smov (%p284_p12), [#allocation6]  }
 0x177   :  { %286 = sbr.rel (!%p284_p12) target bundleno = 327 (0x147), region = 164  ;;  %v340_v2 = vmul.f32 (%p284_p12), 11.313708, %v338_v0  ;;  %v341_v3 = vmul.f32 (%p284_p12), 11.313708, %v339_v1  ;;  %s349_s10 = sshll.u32 (%p284_p12), %s1039_s13, 4  ;;  %s350_s10 = int_to_ptr.vmem [resolvable:$true] %s349_s10 }
 0x178   :  { %s988_s11 = scalar_lea.vmem (%p284_p12), %s350_s10, 256  ;;  %p993_p0 = scmp.lt.s32.totalorder (%p284_p12), %s350_s10, %s350_s10 }
 0x179   :  { %342 = vst [vmem:[#allocation6] sm:$0xff] (%p284_p12), %v340_v2  ;;  %343 = vst [vmem:[#allocation6 + $0x8] sm:$0xff] (%p284_p12), %v341_v3  ;;  %p989_p13 = scmp.ne.s32.totalorder (%p284_p12), %s350_s10, %s988_s11  ;;  %p994_p1 = scmp.lt.s32.totalorder (%p284_p12), %s988_s11, %s988_s11 }
 0x17b   :  { %p995_p8 = por (%p284_p12), %p994_p1, %p993_p0 }
 0x17d   :  { %p996_p2 = pnand %p995_p8, %p989_p13 }
 0x17f   :  { %999 = shalt.err (!%p996_p2)
}
 0x180   :  { %s1040_s15 = smov 128   ;;  %s1041_s12 = smov 8  }
 0x181   :  { %355 = dma.vmem_to_hbm [thread:$0]  %s350_s10, 256, %s1343_s2, [#allocation7], %s1040_s15, %s1040_s15, %s1041_s12  }
 0x182   :  { %1016 = dma.done.wait [#allocation7], 256  }
 0x183   :  { %1017 = vsyncadd [#allocation7], 4294967040 }
 0x184   :  { %359 = vsyncpa [#allocation7], 1 }
 0x185   :  { %360 = vsyncmov [#allocation3] }
 0x188   :  { %s361_s1 = vpop.sfrf %360 }
 0x189   :  { %p553_p3 = scmp.ne.s32.totalorder %s361_s1, 0 }
 0x18b   :  { %365 = shalt.err (%p553_p3)  }
 0x18c   :  { %367 = vsyncmov [#allocation3 + $0x1] }
 0x18f   :  { %s368_s14 = vpop.sfrf %367 }
 0x190   :  { %p554_p4 = scmp.ne.s32.totalorder %s368_s14, 0 }
 0x192   :  { %372 = shalt.err (%p554_p4)  }
 0x193   :  { %374 = vsyncmov [#allocation3 + $0x2] }
 0x196   :  { %s375_s29 = vpop.sfrf %374 }
 0x197   :  { %p555_p5 = scmp.ne.s32.totalorder %s375_s29, 0 }
 0x199   :  { %379 = shalt.err (%p555_p5)  }
 0x19a   :  { %381 = vsyncmov [#allocation3 + $0x3] }
 0x19d   :  { %s382_s5 = vpop.sfrf %381 }
 0x19e   :  { %p556_p6 = scmp.ne.s32.totalorder %s382_s5, 0 }
 0x1a0   :  { %386 = shalt.err (%p556_p6)  }
 0x1a1   :  { %388 = vsyncmov [#allocation3 + $0x4] }
 0x1a4   :  { %s389_s2 = vpop.sfrf %388 }
 0x1a5   :  { %p557_p7 = scmp.ne.s32.totalorder %s389_s2, 0 }
 0x1a7   :  { %393 = shalt.err (%p557_p7)  }
 0x1a8   :  { %395 = vsyncmov [#allocation3 + $0x5] }
 0x1ab   :  { %s396_s18 = vpop.sfrf %395 }
 0x1ac   :  { %p558_p9 = scmp.ne.s32.totalorder %s396_s18, 0 }
 0x1ae   :  { %400 = shalt.err (%p558_p9)  }
 0x1af   :  { %402 = vsyncmov [#allocation3 + $0x6] }
 0x1b2   :  { %s403_s22 = vpop.sfrf %402 }
 0x1b3   :  { %p559_p10 = scmp.ne.s32.totalorder %s403_s22, 0 }
 0x1b5   :  { %407 = shalt.err (%p559_p10)  }
 0x1b6   :  { %409 = vsyncmov [#allocation3 + $0x7] }
 0x1b9   :  { %s410_s23 = vpop.sfrf %409 }
 0x1ba   :  { %p560_p11 = scmp.ne.s32.totalorder %s410_s23, 0 }
 0x1bc   :  { %414 = shalt.err (%p560_p11)  }
 0x1bd   :  { %416 = vsyncmov [#allocation3 + $0x8] }
 0x1c0   :  { %s417_s19 = vpop.sfrf %416 }
 0x1c1   :  { %p561_p12 = scmp.ne.s32.totalorder %s417_s19, 0 }
 0x1c3   :  { %421 = shalt.err (%p561_p12)  }
 0x1c4   :  { %423 = vsyncmov [#allocation3 + $0x9] }
 0x1c7   :  { %s424_s21 = vpop.sfrf %423 }
 0x1c8   :  { %p562_p13 = scmp.ne.s32.totalorder %s424_s21, 0 }
 0x1ca   :  { %428 = shalt.err (%p562_p13)  }
 0x1cb   :  { %430 = vsyncmov [#allocation3 + $0xa] }
 0x1ce   :  { %s431_s17 = vpop.sfrf %430 }
 0x1cf   :  { %p563_p0 = scmp.ne.s32.totalorder %s431_s17, 0 }
 0x1d1   :  { %435 = shalt.err (%p563_p0)  }
 0x1d2   :  { %437 = vsyncmov [#allocation3 + $0xb] }
 0x1d5   :  { %s438_s24 = vpop.sfrf %437 }
 0x1d6   :  { %p564_p1 = scmp.ne.s32.totalorder %s438_s24, 0 }
 0x1d8   :  { %442 = shalt.err (%p564_p1)  }
 0x1d9   :  { %444 = vsyncmov [#allocation3 + $0xc] }
 0x1dc   :  { %s445_s25 = vpop.sfrf %444 }
 0x1dd   :  { %p565_p8 = scmp.ne.s32.totalorder %s445_s25, 0 }
 0x1df   :  { %449 = shalt.err (%p565_p8)  }
 0x1e0   :  { %451 = vsyncmov [#allocation3 + $0xd] }
 0x1e3   :  { %s452_s20 = vpop.sfrf %451 }
 0x1e4   :  { %p566_p2 = scmp.ne.s32.totalorder %s452_s20, 0 }
 0x1e6   :  { %456 = shalt.err (%p566_p2)  }
 0x1e7   :  { %458 = vsyncmov [#allocation3 + $0xe] }
 0x1ea   :  { %s459_s28 = vpop.sfrf %458 }
 0x1eb   :  { %p567_p3 = scmp.ne.s32.totalorder %s459_s28, 0 }
 0x1ed   :  { %463 = shalt.err (%p567_p3)  }
 0x1ee   :  { %465 = vsyncmov [#allocation3 + $0xf] }
 0x1f1   :  { %s466_s26 = vpop.sfrf %465 }
 0x1f2   :  { %p568_p4 = scmp.ne.s32.totalorder %s466_s26, 0 }
 0x1f4   :  { %470 = shalt.err (%p568_p4)  }

</bundles_post_ra>
